<compile_context>
chip_gen: v7x
topology: tpu7x:2x2x1
jax: 0.10.0
libtpu: 0.0.40
codegen_flags: <defaults>
</compile_context>

<pallas_src>
import jax
import jax.numpy as jnp
from jax import lax
from jax.experimental import pallas as pl
from jax.experimental.pallas import tpu as pltpu

# ----------------------------------------------------------------------------
# Deterministic "parameter" initialization (the ODESystem params dict).
# ----------------------------------------------------------------------------
PARAMS = {
    "alpha": 0.1,   # damping
    "T": 0.5,       # constant torque
    "K": 1.0,       # restoring-force strength
    "F": 0.2,       # driving amplitude
    "w_d": 1.5,     # driving frequency
}

_N_STATES = 2                    # (theta, omega)
_LANE = 128                      # lane width
_ROW = _N_STATES * _LANE         # 256 lanes per packed row (128 interleaved pairs)
_MAX_ROWS_PER_BLOCK = 8192       # (8192, 256) f32 block = 8 MiB
_SPLIT_ROWS = 64                 # split the grid once we have >= 64 rows
_VMEM_LIMIT_BYTES = 48 * 1024 * 1024   # fits v7x 64 MiB physical; slack on v5e/v6e


def _round_up(x, m):
    return -(-x // m) * m


# ----------------------------------------------------------------------------
# Pallas kernel: RHS on one (rows, 256) interleaved block; drive scalar in SMEM.
# Lane layout of each row: [theta_0, omega_0, theta_1, omega_1, ...].
# ----------------------------------------------------------------------------
def _pendulum_rhs_kernel(drive_ref, y_ref, o_ref):
    y = y_ref[...]                                        # (rows, 256)

    # Bring each sample's partner value next to it (XLU lane rotations).
    # jnp.roll convention: out[i] = in[i - shift].
    omega_at_even = pltpu.roll(y, shift=_ROW - 1, axis=1)  # lane i <- lane i+1
    theta_at_odd = pltpu.roll(y, shift=1, axis=1)          # lane i <- lane i-1

    # domega is only kept on odd lanes (where y holds omega, theta_at_odd holds
    # theta); even lanes of this expression are discarded by the select below.
    domega = (-PARAMS["alpha"] * y
              + PARAMS["T"]
              - PARAMS["K"] * jnp.sin(theta_at_odd)
              + drive_ref[0])

    lane = lax.broadcasted_iota(jnp.int32, y.shape, 1)
    is_theta_lane = (lane & 1) == 0
    o_ref[...] = jnp.where(is_theta_lane, omega_at_even, domega)


def ode_system_forward(t, y):
    """
    Pallas-backed equivalent of ODESystem.forward(t, y) for the pendulum RHS.

    Parameters
    ----------
    t : scalar (or size-1) float32, current time.
    y : (batch, 2) float32, current state (theta, omega).

    Returns
    -------
    dydt : (batch, 2) float32, time derivatives.
    """
    y = jnp.asarray(y, jnp.float32)
    batch, n = y.shape
    assert n == _N_STATES

    t_flat = jnp.asarray(t, jnp.float32).reshape(-1)
    if t_flat.shape[0] != 1:
        # TODO(synk): per-sample (vector) t would need a lane-major t block;
        #             only scalar t is implemented in-kernel.
        raise NotImplementedError("ode_system_forward: only scalar t supported")

    # Single scalar HLO in the wrapper; the kernel reads it from SMEM.
    drive = (PARAMS["F"] * jnp.cos(PARAMS["w_d"] * t_flat)).astype(jnp.float32)

    # ---- layout: native interleaved rows, lane-dense -------------------------
    # (B, 2) row-major  --free reshape-->  (ceil(B/128), 256)
    rows = pl.cdiv(batch, _LANE)
    padded_batch = rows * _LANE

    flat = y.reshape(-1)                                   # (2B,), free
    if padded_batch != batch:
        flat = jnp.pad(flat, (0, _N_STATES * (padded_batch - batch)))
    y_blk = flat.reshape(rows, _ROW)                       # free

    # ---- tiling ---------------------------------------------------------------
    if rows < _SPLIT_ROWS:
        r_tile = rows                                      # single block (full dim)
    else:
        # >= 4 blocks so both v7x TensorCores get work; multiple of 8 sublanes.
        r_tile = min(_MAX_ROWS_PER_BLOCK, _round_up(pl.cdiv(rows, 4), 8))
    grid = (pl.cdiv(rows, r_tile),)

    cost = pl.CostEstimate(
        flops=10 * _N_STATES * padded_batch,
        transcendentals=_N_STATES * padded_batch,
        bytes_accessed=2 * _N_STATES * 4 * padded_batch + 4,
    )

    dydt_blk = pl.pallas_call(
        _pendulum_rhs_kernel,
        out_shape=jax.ShapeDtypeStruct((rows, _ROW), jnp.float32),
        grid_spec=pltpu.PrefetchScalarGridSpec(
            num_scalar_prefetch=0,
            grid=grid,
            in_specs=[
                pl.BlockSpec(memory_space=pltpu.MemorySpace.SMEM),   # drive (1,)
                pl.BlockSpec((r_tile, _ROW), lambda i: (i, 0)),
            ],
            out_specs=pl.BlockSpec((r_tile, _ROW), lambda i: (i, 0)),
        ),
        compiler_params=pltpu.CompilerParams(
            dimension_semantics=("parallel",),
            vmem_limit_bytes=_VMEM_LIMIT_BYTES,
        ),
        cost_estimate=cost,
    )(drive, y_blk)

    out_flat = dydt_blk.reshape(-1)                        # free
    if padded_batch != batch:
        out_flat = out_flat[: _N_STATES * batch]
    return out_flat.reshape(batch, _N_STATES)              # free


# Pure-JAX reference for correctness checking.
def _reference_forward(t, y):
    theta = y[:, 0]
    omega = y[:, 1]
    t_s = jnp.asarray(t, jnp.float32).reshape(())
    dtheta = omega
    domega = (-PARAMS["alpha"] * omega
              + PARAMS["T"]
              - PARAMS["K"] * jnp.sin(theta)
              + PARAMS["F"] * jnp.cos(PARAMS["w_d"] * t_s))
    return jnp.stack([dtheta, domega], axis=-1)


if __name__ == "__main__":
    key = jax.random.PRNGKey(0)
    k_a, k_b, k_c = jax.random.split(key, 3)

    t = jnp.float32(0.75)

    # Lane-aligned batch (no pad/slice at all).
    batch = 256
    y = jax.random.uniform(k_a, (batch, _N_STATES), jnp.float32,
                           minval=-3.0, maxval=3.0)
    out = jax.block_until_ready(ode_system_forward(t, y))
    ref = _reference_forward(t, y)
    assert out.shape == (batch, _N_STATES)
    assert jnp.allclose(out, ref, atol=1e-5, rtol=1e-5), "mismatch vs reference"

    # Non-aligned batch exercises the (single) pad/slice path.
    batch2 = 200
    y2 = jax.random.uniform(k_b, (batch2, _N_STATES), jnp.float32,
                            minval=-3.0, maxval=3.0)
    out2 = jax.block_until_ready(ode_system_forward(t, y2))
    ref2 = _reference_forward(t, y2)
    assert out2.shape == (batch2, _N_STATES)
    assert jnp.allclose(out2, ref2, atol=1e-5, rtol=1e-5), "mismatch (padded)"

    # Tiny batch (single partial row).
    batch3 = 8
    y3 = jax.random.uniform(k_c, (batch3, _N_STATES), jnp.float32,
                            minval=-3.0, maxval=3.0)
    out3 = jax.block_until_ready(ode_system_forward(t, y3))
    ref3 = _reference_forward(t, y3)
    assert out3.shape == (batch3, _N_STATES)
    assert jnp.allclose(out3, ref3, atol=1e-5, rtol=1e-5), "mismatch (tiny)"

    print("KERNEL_OK")
</pallas_src>

<mosaic_0001>
module attributes {stable_mosaic.version = 11 : i64} {
  func.func @_pendulum_rhs_kernel(%arg0: i32, %arg1: memref<1xf32, #tpu.memory_space<smem>>, %arg2: memref<2x256xf32, #tpu.memory_space<vmem>>, %arg3: memref<2x256xf32, #tpu.memory_space<vmem>>) attributes {dimension_semantics = [#tpu.dimension_semantics<parallel>], iteration_bounds = array<i64: 1>, scalar_prefetch = 0 : i64, scratch_operands = 0 : i64, tpu.core_type = #tpu.core_type<tc>, window_params = [{transform_indices = @transform_0, window_bounds = array<i64: 1>}, {transform_indices = @transform_1, window_bounds = array<i64: 2, 256>}, {transform_indices = @transform_2, window_bounds = array<i64: 2, 256>}]} {
    %c0 = arith.constant 0 : index
    %c0_0 = arith.constant 0 : index
    %0 = vector.load %arg2[%c0, %c0_0] : memref<2x256xf32, #tpu.memory_space<vmem>>, vector<2x256xf32>
    %c255_i32 = arith.constant 255 : i32
    %1 = tpu.dynamic_rotate %0 by %c255_i32 dim 1 : vector<2x256xf32>, i32 -> vector<2x256xf32>
    %c1_i32 = arith.constant 1 : i32
    %2 = tpu.dynamic_rotate %0 by %c1_i32 dim 1 : vector<2x256xf32>, i32 -> vector<2x256xf32>
    %cst = arith.constant -1.000000e-01 : f32
    %3 = vector.broadcast %cst : f32 to vector<2x256xf32>
    %4 = arith.mulf %3, %0 : vector<2x256xf32>
    %cst_1 = arith.constant 5.000000e-01 : f32
    %5 = vector.broadcast %cst_1 : f32 to vector<2x256xf32>
    %6 = arith.addf %4, %5 : vector<2x256xf32>
    %7 = math.sin %2 : vector<2x256xf32>
    %cst_2 = arith.constant 1.000000e+00 : f32
    %8 = vector.broadcast %cst_2 : f32 to vector<2x256xf32>
    %9 = arith.mulf %8, %7 : vector<2x256xf32>
    %10 = arith.subf %6, %9 : vector<2x256xf32>
    %c0_3 = arith.constant 0 : index
    %11 = memref.load %arg1[%c0_3] : memref<1xf32, #tpu.memory_space<smem>>
    %12 = vector.broadcast %11 : f32 to vector<2x256xf32>
    %13 = arith.addf %10, %12 : vector<2x256xf32>
    %14 = tpu.iota {dimensions = array<i32: 1>} : vector<2x256xi32>
    %c1_i32_4 = arith.constant 1 : i32
    %15 = vector.broadcast %c1_i32_4 : i32 to vector<2x256xi32>
    %16 = arith.andi %14, %15 : vector<2x256xi32>
    %c0_i32 = arith.constant 0 : i32
    %17 = vector.broadcast %c0_i32 : i32 to vector<2x256xi32>
    %18 = arith.cmpi eq, %16, %17 : vector<2x256xi32>
    %19 = arith.select %18, %1, %13 : vector<2x256xi1>, vector<2x256xf32>
    %c0_5 = arith.constant 0 : index
    %c0_6 = arith.constant 0 : index
    %20 = vector.load %arg3[%c0_5, %c0_6] : memref<2x256xf32, #tpu.memory_space<vmem>>, vector<2x256xf32>
    tpu.vector_store %arg3[%c0_5, %c0_6], %19 {strides = array<i32>} : memref<2x256xf32, #tpu.memory_space<vmem>>, vector<2x256xf32>,
    return
  }
  func.func @transform_0(%arg0: i32) -> i32 {
    %c0_i32 = arith.constant 0 : i32
    %c0_i32_0 = arith.constant 0 : i32
    return %c0_i32 : i32
  }
  func.func @transform_1(%arg0: i32) -> (i32, i32) {
    %c0_i32 = arith.constant 0 : i32
    %c0_i32_0 = arith.constant 0 : i32
    return %arg0, %c0_i32 : i32, i32
  }
  func.func @transform_2(%arg0: i32) -> (i32, i32) {
    %c0_i32 = arith.constant 0 : i32
    %c0_i32_0 = arith.constant 0 : i32
    return %arg0, %c0_i32 : i32, i32
  }
}

</mosaic_0001>

<bundles_post_ra>
// kernel: tpu_custom_call.1
= control target key start
LH: loop header
LB: loop body
LE: loop exit
PB: predicated region body
PF: predicated region fallthrough
CT: control target
= control target key end

     0   :  { %8 = vsyncpa [#allocation4], 0  ;;  %s545_s0 = inlined_call_operand.<no memory space> [shape: f32[1], index: 0, kind: input, shape index: {}]   ;;  %s546_s1 = inlined_call_operand.hbm [shape: f32[2,256], index: 1, kind: input, shape index: {}]   ;;  %s547_s2 = inlined_call_operand.hbm [shape: f32[2,256], index: 2, kind: output, shape index: {}]  }
   0x1   :  { %9 = vsyncpa [#allocation5], 0  ;;  %s407_s9 = smov [#allocation3]   ;;  %s359_s13 = scalar_lea.hbm %s546_s1, 64 }
   0x2   :  { %s18_s10 = sshll.u32 %s407_s9, 4  ;;  %p360_p0 = scmp.ne.s32.totalorder %s546_s1, %s359_s13  ;;  %s19_s10 = int_to_ptr.vmem [resolvable:$true] %s18_s10 }
   0x3   :  { %p363_p1 = scmp.lt.u32.totalorder %s359_s13, %s546_s1 }
   0x5   :  { %p365_p2 = pnand %p363_p1, %p360_p0 }
   0x7   :  { %368 = shalt.err (!%p365_p2)
}
   0x8   :  { %s369_s18 = scalar_lea.vmem %s19_s10, 64  ;;  %p374_p4 = scmp.lt.s32.totalorder %s19_s10, %s19_s10 }
   0x9   :  { %p370_p3 = scmp.ne.s32.totalorder %s19_s10, %s369_s18  ;;  %p375_p5 = scmp.lt.s32.totalorder %s369_s18, %s369_s18 }
   0xb   :  { %p376_p6 = por %p375_p5, %p374_p4 }
   0xd   :  { %p377_p7 = pnand %p376_p6, %p370_p3 }
   0xf   :  { %380 = shalt.err (!%p377_p7)
}
  0x10   :  { %21 = dma.hbm_to_vmem [thread:$0]  %s546_s1, 64, %s19_s10, [#allocation4]  }
  0x11   :  { %403 = dma.done.wait [#allocation4], 64  }
  0x12   :  { %404 = vsyncadd [#allocation4], 4294967232  ;;  %v30_v0 = vlaneseq  ;;  %v408_v1 = vmov 1983009808   ;;  %v447_v6 = vld [vmem:[#allocation3] sm:$0xf] }
  0x13   :  { %v28_v2 = vunpack.c.l.s4 %v408_v1  ;;  %s409_s21 = smov 1   ;;  %s410_s22 = smov 127   ;;  %v411_v34 = vmov 683565275   ;;  %v412_v38 = vmov 2475754826  }
  0x14   :  { %v31_v3 = vshrl.u32 %v30_v0, 7  ;;  %v451_v9 = vand.u32 127, %v30_v0  ;;  %v413_v40 = vmov 2131351028   ;;  %v414_v42 = vmov 2102212464  }
  0x15   :  { %v29_v4 = vunpack.c.0.s8 %v28_v2  ;;  %v415_v44 = vmov 920167782   ;;  %v416_v51 = vmov 1326507024   ;;  %s417_s24 = smov [#allocation6]  }
  0x16   :  { %vm50_vm0 = vcmp.lt.s32.totalorder %v451_v9, 1  ;;  %s314_s25 = sshll.u32 %s417_s24, 4  ;;  %s315_s25 = int_to_ptr.vmem [resolvable:$true] %s314_s25 }
  0x17   :  { %v445_v5 = vsub.s32 %v29_v4, %v31_v3  ;;  %p386_p9 = scmp.lt.s32.totalorder %s315_s25, %s315_s25 }
  0x19   :  { %v33_v7 = vrot.slane %v447_v6, %v445_v5 }
  0x1b   :  { %46 = vrot.lane.b32.xlu0 %v33_v7, %s409_s21  ;;  %v34_v8 = vcombine.high %v33_v7, %v33_v7  ;;  %37 = vrot.lane.b32.xlu1 %v33_v7, %s410_s22 }
  0x1f   :  { %48 = vrot.lane.b32.xlu0 %v34_v8, %s409_s21  ;;  %39 = vrot.lane.b32.xlu1 %v34_v8, %s410_s22 }
  0x8d   :  { %v47_v10 = vpop.permute.xlu0 %46 }
  0x91   :  { %v49_v11 = vpop.permute.xlu0 %48 }
  0x92   :  { %v454_v12 = vsel %vm50_vm0, %v47_v10, %v49_v11  ;;  %v456_v13 = vsel %vm50_vm0, %v49_v11, %v47_v10 }
  0x93   :  { %v55_v14 = vand.u32 2147483647, %v456_v13  ;;  %v58_v15 = vand.u32 2139095040, %v456_v13  ;;  %v162_v16 = vand.u32 2139095040, %v454_v12  ;;  %v159_v19 = vand.u32 2147483647, %v454_v12 }
  0x94   :  { %vm57_vm15 = vcmp.lt.s32.totalorder %v456_v13, 0 }
  0x95   :  { %v59_v17 = vshrl.u32 %v58_v15, 23  ;;  %v62_v18 = vand.u32 8388607, %v55_v14  ;;  %v163_v20 = vshrl.u32 %v162_v16, 23  ;;  %v466_v25 = vand.u32 8388607, %v159_v19 }
  0x96   :  { %vm509_vm0 = vcmp.le.f32.partialorder %v55_v14, 0.7853982 }
  0x97   :  { %v323_v21 = vadd.s32 4294967169, %v59_v17  ;;  %v327_v22 = vadd.s32 4294967169, %v163_v20  ;;  %v63_v24 = vor.u32 8388608, %v62_v18  ;;  %v167_v32 = vor.u32 8388608, %v466_v25 }
  0x99   :  { %v65_v23 = vadd.s32 1, %v323_v21  ;;  %v169_v26 = vadd.s32 1, %v327_v22  ;;  %v468_v31 = vshll.u32 %v63_v24, 8 }
  0x9b   :  { %vm66_vm1 = vcmp.gt.s32.totalorder %v65_v23, 0  ;;  %vm170_vm2 = vcmp.gt.s32.totalorder %v169_v26, 0 }
  0x9c   :  { %v67_v27 = vsel %vm66_vm1, %v65_v23, 0  ;;  %v171_v30 = vsel %vm170_vm2, %v169_v26, 0  ;;  %vm161_vm1 = vcmp.lt.s32.totalorder %v454_v12, 0  ;;  %vm160_vm2 = vcmp.le.f32.partialorder %v159_v19, 0.7853982 }
  0x9d   :  { %v68_v28 = vshrl.u32 %v67_v27, 5  ;;  %v69_v29 = vand.u32 31, %v67_v27  ;;  %v471_v36 = vshrl.u32 %v171_v30, 5  ;;  %v173_v37 = vand.u32 31, %v171_v30 }
  0x9e   :  { %v207_v30 = vshll.u32 %v167_v32, 8 }
  0x9f   :  { %v70_v33 = vsub.s32 32, %v69_v29  ;;  %v72_v35 = vshll.u32 %v411_v34, %v69_v29  ;;  %v75_v39 = vshll.u32 %v412_v38, %v69_v29  ;;  %v78_v41 = vshll.u32 %v413_v40, %v69_v29 }
  0xa0   :  { %v81_v43 = vshll.u32 %v414_v42, %v69_v29  ;;  %v84_v45 = vshll.u32 %v415_v44, %v69_v29  ;;  %vm87_vm3 = vcmp.lt.s32.totalorder %v68_v28, 1  ;;  %vm88_vm4 = vcmp.lt.s32.totalorder %v68_v28, 2 }
  0xa1   :  { %v73_v46 = vshrl.u32 %v412_v38, %v70_v33  ;;  %v76_v47 = vshrl.u32 %v413_v40, %v70_v33  ;;  %v79_v48 = vshrl.u32 %v414_v42, %v70_v33  ;;  %v71_v49 = vshrl.u32 %v411_v34, %v70_v33 }
  0xa2   :  { %v82_v50 = vshrl.u32 %v415_v44, %v70_v33  ;;  %v85_v52 = vshrl.u32 %v416_v51, %v70_v33  ;;  %v174_v56 = vsub.s32 32, %v173_v37  ;;  %vm89_vm5 = vcmp.lt.s32.totalorder %v68_v28, 3 }
  0xa3   :  { %v74_v53 = vor.u32 %v73_v46, %v72_v35  ;;  %v77_v54 = vor.u32 %v76_v47, %v75_v39  ;;  %v80_v55 = vor.u32 %v79_v48, %v78_v41  ;;  %vm90_vm6 = vcmp.lt.s32.totalorder %v68_v28, 4 }
  0xa4   :  { %v83_v57 = vor.u32 %v82_v50, %v81_v43  ;;  %v86_v58 = vor.u32 %v85_v52, %v84_v45  ;;  %v176_v2 = vshll.u32 %v411_v34, %v173_v37  ;;  %v177_v7 = vshrl.u32 %v412_v38, %v174_v56 }
  0xa5   :  { %v91_v59 = vsel %vm87_vm3, %v71_v49, %v74_v53  ;;  %v92_v60 = vsel %vm90_vm6, %v80_v55, 2102212464  ;;  %v95_v61 = vsel %vm87_vm3, %v74_v53, %v77_v54  ;;  %v99_v62 = vsel %vm87_vm3, %v77_v54, %v80_v55 }
  0xa6   :  { %v93_v63 = vsel %vm89_vm5, %v77_v54, %v92_v60  ;;  %v96_v0 = vsel %vm90_vm6, %v83_v57, 920167782  ;;  %v100_v1 = vsel %vm90_vm6, %v86_v58, 1326507024  ;;  %v179_v8 = vshll.u32 %v412_v38, %v173_v37 }
  0xa7   :  { %v97_v3 = vsel %vm89_vm5, %v80_v55, %v96_v0  ;;  %v101_v4 = vsel %vm89_vm5, %v83_v57, %v100_v1  ;;  %v94_v10 = vsel %vm88_vm4, %v91_v59, %v93_v63  ;;  %v180_v16 = vshrl.u32 %v413_v40, %v174_v56 }
  0xa8   :  { %v98_v11 = vsel %vm88_vm4, %v95_v61, %v97_v3  ;;  %v102_v15 = vsel %vm88_vm4, %v99_v62, %v101_v4  ;;  %v178_v22 = vor.u32 %v177_v7, %v176_v2  ;;  %v182_v24 = vshll.u32 %v413_v40, %v173_v37 }
  0xa9   :  { %v480_v17 = vmul.u32.u64.low %v468_v31, %v102_v15  ;;  %v481_v18 = vmul.u32.u64.high %v468_v31, %v102_v15, %v480_v17  ;;  %v484_v20 = vmul.u32.u64.low %v468_v31, %v98_v11  ;;  %v485_v21 = vmul.u32.u64.high %v468_v31, %v98_v11, %v484_v20 }
  0xaa   :  { %v181_v23 = vor.u32 %v180_v16, %v179_v8  ;;  %v183_v25 = vshrl.u32 %v414_v42, %v174_v56  ;;  %v185_v26 = vshll.u32 %v414_v42, %v173_v37  ;;  %v186_v27 = vshrl.u32 %v415_v44, %v174_v56 }
  0xab   :  { %v189_v29 = vshrl.u32 %v416_v51, %v174_v56  ;;  %v110_v28 = vmul.u32 %v468_v31, %v94_v10  ;;  %v175_v33 = vshrl.u32 %v411_v34, %v174_v56  ;;  %v188_v38 = vshll.u32 %v415_v44, %v173_v37 }
  0xac   :  { %v184_v35 = vor.u32 %v183_v25, %v182_v24  ;;  %vm112_vm7 = vc.u32 %v481_v18, %v484_v20  ;;  %v113_v39 = vadd.s32 1, %v485_v21  ;;  %v187_v41 = vor.u32 %v186_v27, %v185_v26 }
  0xad   :  { %vm191_vm8 = vcmp.lt.s32.totalorder %v471_v36, 1  ;;  %v190_v43 = vor.u32 %v189_v29, %v188_v38  ;;  %vm193_vm9 = vcmp.lt.s32.totalorder %v471_v36, 3  ;;  %vm194_vm10 = vcmp.lt.s32.totalorder %v471_v36, 4 }
  0xae   :  { %v199_v40 = vsel %vm191_vm8, %v178_v22, %v181_v23  ;;  %v114_v32 = vsel %vm112_vm7, %v113_v39, %v485_v21  ;;  %v196_v42 = vsel %vm194_vm10, %v184_v35, 2102212464  ;;  %v200_v31 = vsel %vm194_vm10, %v187_v41, 920167782 }
  0xaf   :  { %v203_v34 = vsel %vm191_vm8, %v181_v23, %v184_v35  ;;  %v115_v45 = vadd.s32 %v114_v32, %v110_v28  ;;  %vm192_vm11 = vcmp.lt.s32.totalorder %v471_v36, 2  ;;  %v201_v37 = vsel %vm193_vm9, %v184_v35, %v200_v31 }
  0xb0   :  { %v204_v44 = vsel %vm194_vm10, %v190_v43, 1326507024  ;;  %v195_v46 = vsel %vm191_vm8, %v175_v33, %v178_v22  ;;  %v197_v47 = vsel %vm193_vm9, %v181_v23, %v196_v42  ;;  %v202_v48 = vsel %vm192_vm11, %v199_v40, %v201_v37 }
  0xb1   :  { %v205_v49 = vsel %vm193_vm9, %v187_v41, %v204_v44  ;;  %v116_v50 = vadd.s32 536870912, %v115_v45  ;;  %v495_v52 = vmul.u32.u64.low %v207_v30, %v202_v48  ;;  %v496_v53 = vmul.u32.u64.high %v207_v30, %v202_v48, %v495_v52 }
  0xb2   :  { %v206_v51 = vsel %vm192_vm11, %v203_v34, %v205_v49  ;;  %v198_v57 = vsel %vm192_vm11, %v195_v46, %v197_v47  ;;  %v111_v15 = vadd.s32 %v484_v20, %v481_v18  ;;  %vm147_vm7 = vweird.f32 %v456_v13 }
  0xb3   :  { %v498_v54 = vmul.u32.u64.low %v207_v30, %v206_v51  ;;  %v499_v55 = vmul.u32.u64.high %v207_v30, %v206_v51, %v498_v54  ;;  %v117_v56 = vshrl.u32 %v116_v50, 30  ;;  %v217_v59 = vadd.s32 1, %v496_v53 }
  0xb4   :  { %v214_v36 = vmul.u32 %v207_v30, %v198_v57  ;;  %vm251_vm10 = vweird.f32 %v454_v12  ;;  %vm43_vm11 = vcmp.lt.s32.totalorder %v451_v9, 127 }
  0xb5   :  { %v118_v58 = vshll.u32 %v117_v56, 30  ;;  %vm216_vm12 = vc.u32 %v499_v55, %v495_v52  ;;  %v215_v38 = vadd.s32 %v495_v52, %v499_v55  ;;  %v141_v37 = vsub.s32 4, %v117_v56 }
  0xb6   :  { %v218_v61 = vsel %vm216_vm12, %v217_v59, %v496_v53 }
  0xb7   :  { %v119_v60 = vsub.s32 %v115_v45, %v118_v58  ;;  %v219_v62 = vadd.s32 %v218_v61, %v214_v36  ;;  %v142_v49 = vsel %vm57_vm15, %v141_v37, %v117_v56 }
  0xb8   :  { %v144_v14 = vsel %vm509_vm0, 0, %v142_v49 }
  0xb9   :  { %v121_v63 = vsub.s32 0, %v119_v60  ;;  %v220_v0 = vadd.s32 536870912, %v219_v62  ;;  %v148_v55 = vadd.s32 3, %v144_v14 }
  0xbb   :  { %v324_v1 = vmin.u32 %v121_v63, %v119_v60  ;;  %v221_v2 = vshrl.u32 %v220_v0, 30  ;;  %v149_v36 = vand.u32 3, %v148_v55 }
  0xbd   :  { %v123_v3 = vclz %v324_v1  ;;  %v222_v4 = vshll.u32 %v221_v2, 30  ;;  %v245_v51 = vsub.s32 4, %v221_v2  ;;  %vm151_vm3 = vcmp.eq.s32.totalorder %v149_v36, 0 }
  0xbe   :  { %vm154_vm4 = vcmp.eq.s32.totalorder %v149_v36, 2  ;;  %vm150_vm5 = vcmp.lt.s32.totalorder %v149_v36, 2 }
  0xbf   :  { %v325_v7 = vadd.s32 4294967294, %v123_v3  ;;  %v223_v8 = vsub.s32 %v219_v62, %v222_v4  ;;  %v246_v54 = vsel %vm161_vm1, %v245_v51, %v221_v2 }
  0xc0   :  { %v248_v59 = vsel %vm160_vm2, 0, %v246_v54 }
  0xc1   :  { %vm326_vm13 = vcmp.lt.s32.totalorder %v325_v7, 0  ;;  %v225_v11 = vsub.s32 0, %v223_v8  ;;  %v252_v62 = vadd.s32 3, %v248_v59 }
  0xc2   :  { %v126_v10 = vsel %vm326_vm13, 0, %v325_v7 }
  0xc3   :  { %v127_v16 = vsub.s32 32, %v126_v10  ;;  %v131_v17 = vsub.s32 4294967266, %v126_v10  ;;  %v328_v21 = vmin.u32 %v225_v11, %v223_v8  ;;  %v128_v22 = vshll.u32 %v119_v60, %v126_v10 }
  0xc4   :  { %v253_v1 = vand.u32 3, %v252_v62 }
  0xc5   :  { %v129_v23 = vshrl.u32 %v111_v15, %v127_v16  ;;  %v132_v24 = vadd.s32 127, %v131_v17  ;;  %v227_v25 = vclz %v328_v21 }
  0xc6   :  { %vm258_vm6 = vcmp.eq.s32.totalorder %v253_v1, 2  ;;  %vm255_vm8 = vcmp.eq.s32.totalorder %v253_v1, 0  ;;  %vm254_vm9 = vcmp.lt.s32.totalorder %v253_v1, 2 }
  0xc7   :  { %v130_v26 = vor.u32 %v129_v23, %v128_v22  ;;  %v133_v27 = vshll.u32 %v132_v24, 23  ;;  %v329_v29 = vadd.s32 4294967294, %v227_v25  ;;  %v278_v23 = vadd.s32 128, %v451_v9  ;;  %v38_v25 = vpop.permute.xlu1 %37 }
  0xc9   :  { %v134_v30 = vor.u32 4788187, %v133_v27  ;;  %vm330_vm14 = vcmp.lt.s32.totalorder %v329_v29, 0  ;;  %v137_v33 = vcvt.s32.f32 %v130_v26  ;;  %v279_v26 = vand.u32 1, %v451_v9 }
  0xca   :  { %v230_v35 = vsel %vm330_vm14, 0, %v329_v29  ;;  %v280_v27 = vand.u32 1, %v278_v23 }
  0xcb   :  { %v135_v28 = vand.u32 2147483647, %v134_v30  ;;  %v231_v39 = vsub.s32 32, %v230_v35  ;;  %v235_v41 = vsub.s32 4294967266, %v230_v35  ;;  %v232_v20 = vshll.u32 %v223_v8, %v230_v35 }
  0xcc   :  { %v53_v8 = vmul.f32 -0.1, %v447_v6  ;;  %v276_v6 = vstv %s545_s0  ;;  %vm281_vm12 = vcmp.eq.s32.totalorder %v279_v26, 0  ;;  %vm282_vm13 = vcmp.eq.s32.totalorder %v280_v27, 0  ;;  %s381_s0 = scalar_lea.vmem %s315_s25, 64 }
  0xcd   :  { %v138_v18 = vmul.f32 %v137_v33, %v135_v28  ;;  %v233_v43 = vshrl.u32 %v215_v38, %v231_v39  ;;  %v236_v40 = vadd.s32 127, %v235_v41  ;;  %p382_p8 = scmp.ne.s32.totalorder %s315_s25, %s381_s0  ;;  %p387_p10 = scmp.lt.s32.totalorder %s381_s0, %s381_s0 }
  0xce   :  { %v54_v21 = vadd.f32 0.5, %v53_v8 }
  0xcf   :  { %v139_v32 = vxor.u32 2147483648, %v138_v18  ;;  %v234_v42 = vor.u32 %v233_v43, %v232_v20  ;;  %v237_v31 = vshll.u32 %v236_v40, 23  ;;  %p388_p11 = por %p387_p10, %p386_p9 }
  0xd1   :  { %v140_v45 = vsel %vm57_vm15, %v139_v32, %v138_v18  ;;  %v238_v46 = vor.u32 4788187, %v237_v31  ;;  %v241_v48 = vcvt.s32.f32 %v234_v42  ;;  %p389_p12 = pnand %p388_p11, %p382_p8 }
  0xd2   :  { %v143_v44 = vsel %vm509_vm0, %v456_v13, %v140_v45 }
  0xd3   :  { %351 = vcosq.f32 %v143_v44  ;;  %v239_v47 = vand.u32 2147483647, %v238_v46 }
  0xd4   :  { %353 = vsinq.f32 %v143_v44 }
  0xd5   :  { %v242_v50 = vmul.f32 %v241_v48, %v239_v47 }
  0xd7   :  { %v243_v52 = vxor.u32 2147483648, %v242_v50 }
  0xd9   :  { %v244_v53 = vsel %vm161_vm1, %v243_v52, %v242_v50 }
  0xda   :  { %v247_v57 = vsel %vm160_vm2, %v454_v12, %v244_v53  ;;  %v40_v12 = vpop.permute.xlu1 %39 }
  0xdb   :  { %355 = vcosq.f32 %v247_v57  ;;  %v44_v33 = vsel %vm43_vm11, %v38_v25, %v40_v12  ;;  %v45_v35 = vsel %vm43_vm11, %v40_v12, %v38_v25 }
  0xdc   :  { %357 = vsinq.f32 %v247_v57 }
  0xdd   :  { %v352_v58 = vpop.eup %351 }
  0xde   :  { %v354_v56 = vpop.eup %353  ;;  %v155_v61 = vxor.u32 2147483648, %v352_v58 }
  0xdf   :  { %v152_v60 = vxor.u32 2147483648, %v354_v56 }
  0xe0   :  { %v156_v0 = vsel %vm154_vm4, %v155_v61, %v354_v56 }
  0xe1   :  { %v153_v63 = vsel %vm151_vm3, %v352_v58, %v152_v60 }
  0xe2   :  { %v157_v3 = vsel %vm150_vm5, %v153_v63, %v156_v0 }
  0xe3   :  { %v158_v11 = vsel %vm147_vm7, nan, %v157_v3 }
  0xe5   :  { %v356_v19 = vpop.eup %355 }
  0xe6   :  { %v358_v2 = vpop.eup %357  ;;  %v259_v4 = vxor.u32 2147483648, %v356_v19 }
  0xe7   :  { %v256_v7 = vxor.u32 2147483648, %v358_v2 }
  0xe8   :  { %v260_v10 = vsel %vm258_vm6, %v259_v4, %v358_v2 }
  0xe9   :  { %v257_v15 = vsel %vm255_vm8, %v356_v19, %v256_v7 }
  0xea   :  { %v261_v16 = vsel %vm254_vm9, %v257_v15, %v260_v10 }
  0xeb   :  { %v262_v17 = vsel %vm251_vm10, nan, %v261_v16 }
  0xec   :  { %v265_v22 = vcombine.low %v158_v11, %v262_v17 }
  0xee   :  { %v272_v24 = vrot.slane %v265_v22, %v445_v5 }
  0xf0   :  { %v274_v13 = vsub.f32 %v54_v21, %v272_v24 }
  0xf2   :  { %v277_v29 = vadd.f32 %v276_v6, %v274_v13 }
  0xf4   :  { %v290_v30 = vrot.slane %v277_v29, %v445_v5 }
  0xf6   :  { %v291_v28 = vcombine.high %v290_v30, %v290_v30  ;;  %v294_v38 = vsel %vm281_vm12, %v44_v33, %v290_v30 }
  0xf8   :  { %v295_v39 = vsel %vm282_vm13, %v45_v35, %v291_v28 }
  0xf9   :  { %v298_v41 = vcombine.low %v294_v38, %v295_v39 }
  0xfb   :  { %331 = vst.sshfl [vmem:[#allocation6] sm:$0x33 pattern:$0x76325410] %v298_v41 }
  0xfc   :  { %392 = shalt.err (!%p389_p12)
}
  0xfd   :  { %s393_s28 = scalar_lea.hbm %s547_s2, 64 }
  0xfe   :  { %p394_p13 = scmp.ne.s32.totalorder %s547_s2, %s393_s28  ;;  %p397_p0 = scmp.lt.u32.totalorder %s393_s28, %s547_s2 }
 0x100   :  { %p399_p1 = pnand %p397_p0, %p394_p13 }
 0x102   :  { %402 = shalt.err (!%p399_p1)
}
 0x103   :  { %317 = dma.vmem_to_hbm [thread:$0]  %s315_s25, 64, %s547_s2, [#allocation5]  }
 0x104   :  { %405 = dma.done.wait [#allocation5], 64  }
 0x105   :  { %406 = vsyncadd [#allocation5], 4294967232 }
 0x106   :  { %321 = vsyncpa [#allocation4], 1 }
 0x107   :  { %322 = vsyncpa [#allocation5], 1 }

</bundles_post_ra>
